<compile_context>
chip_gen: v5e
topology: v5e:2x2
jax: 0.10.0
libtpu: 0.0.40
codegen_flags: <defaults>
</compile_context>

<pallas_src>
import jax
import jax.numpy as jnp
from jax.experimental import pallas as pl
from jax.experimental.pallas import tpu as pltpu


def _round_up(x, m):
    return (x + m - 1) // m * m


def _block_kernel(a_ref, w1_ref, b1_ref, w2_ref, b2_ref, o_ref):
    """One batch tile per grid step.

    a_ref : (nb*P + 8, K1)   conv1 im2row (K1 = 3*W*Cin) built by the wrapper;
                             the last 8 rows are zero so conv2's row shifts
                             stay in bounds without masking or wraparound.
    w1_ref: (K1, NMID)       conv1 Toeplitz matrix (kh, kw, cin folded into K).
    b1_ref: (1, NMID)        f32 bias tiled along width, zero in padded lanes.
    w2_ref: (3*NMID, NOUT)   conv2 Toeplitz matrix, kh taps stacked along K.
    b2_ref: (1, NOUT)        f32.
    o_ref : (nb*P, NOUT)     lane-dense output tile (padding rows/lanes are
                             garbage and sliced off by the wrapper).
    """
    rows_out = o_ref.shape[0]

    # ---- conv1: a single MXU push (K = 3*W*Cin), f32 accumulation, ReLU ----
    acc1 = jnp.dot(a_ref[...], w1_ref[...], preferred_element_type=jnp.float32)
    h = jnp.maximum(acc1 + b1_ref[...], 0.0)          # (rows_out + 8, NMID) f32
    h = h.astype(w2_ref.dtype)                        # MXU dtype for conv2

    # ---- conv2: fuse the 3 kh taps into K by lane-concatenating row-shifted
    # copies of h (each a 128-aligned lane block).  Row shifts are static
    # sublane offsets of an in-register value; no reshapes, no masked stores.
    lhs = jnp.concatenate(
        [h[0:rows_out], h[1:rows_out + 1], h[2:rows_out + 2]], axis=1)
    acc2 = jnp.dot(lhs, w2_ref[...], preferred_element_type=jnp.float32)
    o_ref[...] = (acc2 + b2_ref[...]).astype(o_ref.dtype)


def _conv_toeplitz(w, w_in, w_out, k_pad, n_pad):
    """Row-Toeplitz matrices of a 3x3 VALID conv, stacked along K and padded.

    w: (C_out, C_in, 3, 3) in PyTorch OIHW layout.  Returns (3*k_pad, n_pad):
      M[kh*k_pad + x1*C_in + c, x2*C_out + o] = w[o, c, kh, x1 - x2]
    for 0 <= x1 - x2 < 3 and x2 < w_out, zero elsewhere (incl. padding), so
      out_row(y2) = sum_kh  in_row(y2 + kh) @ M_kh .
    """
    c_out, c_in = w.shape[0], w.shape[1]
    blocks = []
    for kh in range(3):
        m = jnp.zeros((w_in, c_in, w_out, c_out), jnp.float32)
        for kw in range(3):
            eye = jnp.eye(w_out, w_in, k=kw, dtype=jnp.float32)  # eye[x2, x2+kw]=1
            m = m + jnp.einsum('ij,oc->jcio', eye,
                               w[:, :, kh, kw].astype(jnp.float32))
        blk = m.reshape(w_in * c_in, w_out * c_out)
        blk = jnp.pad(blk, ((0, k_pad - w_in * c_in),
                            (0, n_pad - w_out * c_out)))
        blocks.append(blk)
    return jnp.concatenate(blocks, axis=0)


def make_block_fn(w1, b1, w2, b2, img_hw, mxu_dtype=jnp.bfloat16, nb_max=64):
    """Precompute the matmul operands once and return a jitted NCHW forward.

    w1: (Cmid, Cin, 3, 3), b1: (Cmid,), w2: (Cout, Cmid, 3, 3), b2: (Cout,)
    (PyTorch Conv2d layouts).  img_hw is the static (H, W) of the inputs.
    """
    H, W = img_hw
    cmid, cin = w1.shape[0], w1.shape[1]
    cout = w2.shape[0]
    H1, W1s = H - 2, W - 2
    H2, W2s = H - 4, W - 4
    K1 = 3 * W * cin
    NMID = _round_up(W1s * cmid, 128)        # lane-dense intermediate width
    NOUT = _round_up(W2s * cout, 128)        # lane-dense output width
    P = _round_up(H1, 8)                     # 8-aligned rows per image

    # ---- hoisted, per-model constants (NOT rebuilt per call) ----------------
    w1_big = _conv_toeplitz(w1, W, W1s, W * cin, NMID).astype(mxu_dtype)
    w2_big = _conv_toeplitz(w2, W1s, W2s, NMID, NOUT).astype(mxu_dtype)
    b1_big = jnp.pad(jnp.tile(b1.astype(jnp.float32), W1s),
                     (0, NMID - W1s * cmid)).reshape(1, NMID)
    b2_big = jnp.pad(jnp.tile(b2.astype(jnp.float32), W2s),
                     (0, NOUT - W2s * cout)).reshape(1, NOUT)

    @jax.jit
    def fwd(x_nchw):
        N = x_nchw.shape[0]
        assert x_nchw.shape[1:] == (cin, H, W), x_nchw.shape

        # Batch tiling: cap the per-tile batch (vreg / v7x-VMEM budget); split
        # a single big tile in two so both v7x TensorCores get a "parallel"
        # tile, gated on enough per-tile matmul rows to hide step overhead.
        T = pl.cdiv(N, nb_max)
        nb = pl.cdiv(N, T)
        if T == 1 and nb % 2 == 0 and nb * P >= 1024:
            nb //= 2
            T = 2
        Np = T * nb

        # Wrapper-side im2row for conv1 (plain XLA, fused under jit):
        #   A[n, y, kh*W*Cin + x*Cin + c] = x[n, c, y+kh, x]
        # rows >= H1 and padded images are zero; 8 extra zero rows per *tile*
        # keep conv2's in-kernel row shifts in bounds.
        xr = jnp.transpose(x_nchw, (0, 2, 3, 1)).reshape(N, H, W * cin)
        a = jnp.concatenate([xr[:, kh:kh + H1, :] for kh in range(3)], axis=-1)
        a = jnp.pad(a, ((0, Np - N), (0, P - H1), (0, 0)))
        a = a.reshape(T, nb * P, K1)
        a = jnp.pad(a, ((0, 0), (0, 8), (0, 0)))
        a = a.reshape(T * (nb * P + 8), K1).astype(mxu_dtype)

        out = pl.pallas_call(
            _block_kernel,
            out_shape=jax.ShapeDtypeStruct((Np * P, NOUT), x_nchw.dtype),
            grid_spec=pltpu.PrefetchScalarGridSpec(
                num_scalar_prefetch=0,
                grid=(T,),
                in_specs=[
                    pl.BlockSpec((nb * P + 8, K1), lambda t: (t, 0)),
                    # Constant-index weight/bias blocks are only DMA'd once by
                    # the pipeline.  (pl.Buffered(1) would drop their second
                    # VMEM buffer; irrelevant at these sizes.)
                    pl.BlockSpec((K1, NMID), lambda t: (0, 0)),
                    pl.BlockSpec((1, NMID), lambda t: (0, 0)),
                    pl.BlockSpec((3 * NMID, NOUT), lambda t: (0, 0)),
                    pl.BlockSpec((1, NOUT), lambda t: (0, 0)),
                ],
                out_specs=pl.BlockSpec((nb * P, NOUT), lambda t: (t, 0)),
            ),
            compiler_params=pltpu.CompilerParams(
                dimension_semantics=("parallel",)),
        )(a, w1_big, b1_big, w2_big, b2_big)

        # Strip row/lane padding and return NCHW.
        out = out.reshape(Np, P, NOUT)[:N, :H2, :W2s * cout]
        out = out.reshape(N, H2, W2s, cout)
        return jnp.transpose(out, (0, 3, 1, 2))
        # For images much larger than 32x32, add H-strip tiling (4-row halo)
        # and an explicit vmem_limit_bytes (v7x: 64 MiB phys / 32 MiB scoped).

    return fwd


def _reference_forward(x, w1, b1, w2, b2):
    """Pure-JAX reference matching PyTorch Conv2d semantics (VALID padding)."""
    dn = ("NCHW", "OIHW", "NCHW")
    y = jax.lax.conv_general_dilated(x, w1, (1, 1), "VALID",
                                     dimension_numbers=dn)
    y = jnp.maximum(y + b1.reshape(1, -1, 1, 1), 0.0)
    y = jax.lax.conv_general_dilated(y, w2, (1, 1), "VALID",
                                     dimension_numbers=dn)
    return y + b2.reshape(1, -1, 1, 1)


if __name__ == "__main__":
    # Block(in_ch=4, out_ch=8) on 16x16 images, batch 2.
    N, Cin, Cout, H, W = 2, 4, 8, 16, 16

    key = jax.random.PRNGKey(0)
    k_x, k_w1, k_b1, k_w2, k_b2 = jax.random.split(key, 5)

    fan1 = Cin * 3 * 3
    fan2 = Cout * 3 * 3
    w1 = jax.random.uniform(k_w1, (Cout, Cin, 3, 3), jnp.float32,
                            -1.0 / fan1 ** 0.5, 1.0 / fan1 ** 0.5)
    b1 = jax.random.uniform(k_b1, (Cout,), jnp.float32,
                            -1.0 / fan1 ** 0.5, 1.0 / fan1 ** 0.5)
    w2 = jax.random.uniform(k_w2, (Cout, Cout, 3, 3), jnp.float32,
                            -1.0 / fan2 ** 0.5, 1.0 / fan2 ** 0.5)
    b2 = jax.random.uniform(k_b2, (Cout,), jnp.float32,
                            -1.0 / fan2 ** 0.5, 1.0 / fan2 ** 0.5)

    x = jax.random.normal(k_x, (N, Cin, H, W), jnp.float32)

    ref = jax.block_until_ready(_reference_forward(x, w1, b1, w2, b2))

    # Exact path: f32 MXU inputs, f32 accumulation.
    fwd_f32 = make_block_fn(w1, b1, w2, b2, (H, W), mxu_dtype=jnp.float32)
    out = jax.block_until_ready(fwd_f32(x))
    assert out.shape == (N, Cout, H - 4, W - 4), out.shape
    err = float(jnp.max(jnp.abs(out - ref)))
    assert jnp.allclose(out, ref, atol=1e-4, rtol=1e-4), err

    # Fast path for v6e/v7x: bf16 MXU inputs (single-pass MXU), f32 accumulate.
    fwd_bf16 = make_block_fn(w1, b1, w2, b2, (H, W), mxu_dtype=jnp.bfloat16)
    out_bf = jax.block_until_ready(fwd_bf16(x))
    err_bf = float(jnp.max(jnp.abs(out_bf - ref)))
    assert jnp.allclose(out_bf, ref, atol=5e-2, rtol=5e-2), err_bf

    print("KERNEL_OK")
</pallas_src>

<mosaic_0001>
module attributes {stable_mosaic.version = 11 : i64} {
  func.func @_block_kernel(%arg0: i32, %arg1: memref<40x192xf32, #tpu.memory_space<vmem>>, %arg2: memref<192x128xf32, #tpu.memory_space<vmem>>, %arg3: memref<1x128xf32, #tpu.memory_space<vmem>>, %arg4: memref<384x128xf32, #tpu.memory_space<vmem>>, %arg5: memref<1x128xf32, #tpu.memory_space<vmem>>, %arg6: memref<32x128xf32, #tpu.memory_space<vmem>>) attributes {dimension_semantics = [#tpu.dimension_semantics<parallel>], iteration_bounds = array<i64: 1>, scalar_prefetch = 0 : i64, scratch_operands = 0 : i64, tpu.core_type = #tpu.core_type<tc>, window_params = [{transform_indices = @transform_0, window_bounds = array<i64: 40, 192>}, {pipeline_mode = #tpu.pipeline_mode<synchronous>, transform_indices = @transform_1, window_bounds = array<i64: 192, 128>}, {pipeline_mode = #tpu.pipeline_mode<synchronous>, transform_indices = @transform_2, window_bounds = array<i64: 1, 128>}, {pipeline_mode = #tpu.pipeline_mode<synchronous>, transform_indices = @transform_3, window_bounds = array<i64: 384, 128>}, {pipeline_mode = #tpu.pipeline_mode<synchronous>, transform_indices = @transform_4, window_bounds = array<i64: 1, 128>}, {transform_indices = @transform_5, window_bounds = array<i64: 32, 128>}]} {
    %c0 = arith.constant 0 : index
    %c0_0 = arith.constant 0 : index
    %0 = vector.load %arg1[%c0, %c0_0] : memref<40x192xf32, #tpu.memory_space<vmem>>, vector<40x192xf32>
    %c0_1 = arith.constant 0 : index
    %c0_2 = arith.constant 0 : index
    %1 = vector.load %arg2[%c0_1, %c0_2] : memref<192x128xf32, #tpu.memory_space<vmem>>, vector<192x128xf32>
    %cst = arith.constant dense<0.000000e+00> : vector<40x128xf32>
    %2 = tpu.matmul %0, %1, %cst {dimension_numbers = #tpu.dot_dimension_numbers<[1], [0], [0], [1], [0, 0, 1, 1], [], []>} : vector<40x192xf32>, vector<192x128xf32>, vector<40x128xf32> -> vector<40x128xf32>
    %c0_3 = arith.constant 0 : index
    %c0_4 = arith.constant 0 : index
    %3 = vector.load %arg3[%c0_3, %c0_4] : memref<1x128xf32, #tpu.memory_space<vmem>>, vector<1x128xf32>
    %4 = vector.broadcast %3 : vector<1x128xf32> to vector<40x128xf32>
    %5 = arith.addf %2, %4 : vector<40x128xf32>
    %cst_5 = arith.constant 0.000000e+00 : f32
    %6 = vector.broadcast %cst_5 : f32 to vector<40x128xf32>
    %7 = arith.maximumf %5, %6 : vector<40x128xf32>
    %8 = vector.extract_strided_slice %7 {offsets = [0, 0], sizes = [32, 128], strides = [1, 1]} : vector<40x128xf32> to vector<32x128xf32>
    %9 = vector.extract_strided_slice %7 {offsets = [1, 0], sizes = [32, 128], strides = [1, 1]} : vector<40x128xf32> to vector<32x128xf32>
    %10 = vector.extract_strided_slice %7 {offsets = [2, 0], sizes = [32, 128], strides = [1, 1]} : vector<40x128xf32> to vector<32x128xf32>
    %11 = tpu.concatenate %8, %9, %10 in 1 : vector<32x128xf32>, vector<32x128xf32>, vector<32x128xf32> -> vector<32x384xf32>
    %c0_6 = arith.constant 0 : index
    %c0_7 = arith.constant 0 : index
    %12 = vector.load %arg4[%c0_6, %c0_7] : memref<384x128xf32, #tpu.memory_space<vmem>>, vector<384x128xf32>
    %cst_8 = arith.constant dense<0.000000e+00> : vector<32x128xf32>
    %13 = tpu.matmul %11, %12, %cst_8 {dimension_numbers = #tpu.dot_dimension_numbers<[1], [0], [0], [1], [0, 0, 1, 1], [], []>} : vector<32x384xf32>, vector<384x128xf32>, vector<32x128xf32> -> vector<32x128xf32>
    %c0_9 = arith.constant 0 : index
    %c0_10 = arith.constant 0 : index
    %14 = vector.load %arg5[%c0_9, %c0_10] : memref<1x128xf32, #tpu.memory_space<vmem>>, vector<1x128xf32>
    %15 = vector.broadcast %14 : vector<1x128xf32> to vector<32x128xf32>
    %16 = arith.addf %13, %15 : vector<32x128xf32>
    %c0_11 = arith.constant 0 : index
    %c0_12 = arith.constant 0 : index
    %17 = vector.load %arg6[%c0_11, %c0_12] : memref<32x128xf32, #tpu.memory_space<vmem>>, vector<32x128xf32>
    tpu.vector_store %arg6[%c0_11, %c0_12], %16 {strides = array<i32>} : memref<32x128xf32, #tpu.memory_space<vmem>>, vector<32x128xf32>,
    return
  }
  func.func @transform_0(%arg0: i32) -> (i32, i32) {
    %c0_i32 = arith.constant 0 : i32
    %c0_i32_0 = arith.constant 0 : i32
    return %arg0, %c0_i32 : i32, i32
  }
  func.func @transform_1(%arg0: i32) -> (i32, i32) {
    %c0_i32 = arith.constant 0 : i32
    %c0_i32_0 = arith.constant 0 : i32
    %c0_i32_1 = arith.constant 0 : i32
    return %c0_i32, %c0_i32_0 : i32, i32
  }
  func.func @transform_2(%arg0: i32) -> (i32, i32) {
    %c0_i32 = arith.constant 0 : i32
    %c0_i32_0 = arith.constant 0 : i32
    %c0_i32_1 = arith.constant 0 : i32
    return %c0_i32, %c0_i32_0 : i32, i32
  }
  func.func @transform_3(%arg0: i32) -> (i32, i32) {
    %c0_i32 = arith.constant 0 : i32
    %c0_i32_0 = arith.constant 0 : i32
    %c0_i32_1 = arith.constant 0 : i32
    return %c0_i32, %c0_i32_0 : i32, i32
  }
  func.func @transform_4(%arg0: i32) -> (i32, i32) {
    %c0_i32 = arith.constant 0 : i32
    %c0_i32_0 = arith.constant 0 : i32
    %c0_i32_1 = arith.constant 0 : i32
    return %c0_i32, %c0_i32_0 : i32, i32
  }
  func.func @transform_5(%arg0: i32) -> (i32, i32) {
    %c0_i32 = arith.constant 0 : i32
    %c0_i32_0 = arith.constant 0 : i32
    return %arg0, %c0_i32 : i32, i32
  }
}

</mosaic_0001>

<bundles_post_ra>
// kernel: fwd.1
= control target key start
LH: loop header
LB: loop body
LE: loop exit
PB: predicated region body
PF: predicated region fallthrough
CT: control target
= control target key end

     0   :  { %vm58_vm0 = vcmask 523264   ;;  %vm148_vm1 = vcmask 1046528   ;;  %vm162_vm2 = vcmask 1045504   ;;  %s645_s1 = inlined_call_operand.vmem [shape: f32[192,128], index: 1, kind: input, shape index: {}]   ;;  %s646_s2 = inlined_call_operand.vmem [shape: f32[1,128], index: 2, kind: input, shape index: {}]   ;;  %s647_s0 = inlined_call_operand.vmem [shape: f32[40,192], index: 0, kind: input, shape index: {}]   ;;  %s648_s3 = inlined_call_operand.vmem [shape: f32[384,128], index: 3, kind: input, shape index: {}]   ;;  %s649_s4 = inlined_call_operand.vmem [shape: f32[1,128], index: 4, kind: input, shape index: {}]   ;;  %s650_s5 = inlined_call_operand.vmem [shape: f32[32,128], index: 5, kind: output, shape index: {}]  }
   0x1   :  { %v45_v0 = vld [vmem:[%s645_s1 + $0x78] sm:$0xff]  ;;  %v44_v1 = vld [vmem:[%s645_s1 + $0x70] sm:$0xff]  ;;  %v43_v2 = vld [vmem:[%s645_s1 + $0x68] sm:$0xff] }
   0x2   :  { %74 = vmatpush.msra.mxu0 %v45_v0  ;;  %v53_v3 = vld [vmem:[%s645_s1 + $0xb8] sm:$0xff]  ;;  %v42_v4 = vld [vmem:[%s645_s1 + $0x60] sm:$0xff]  ;;  %v52_v5 = vld [vmem:[%s645_s1 + $0xb0] sm:$0xff] }
   0x3   :  { %114 = vmatpush.msra.mxu1 %v53_v3  ;;  %328 = vmatpush.msra.mxu2 %v53_v3  ;;  %v51_v6 = vld [vmem:[%s645_s1 + $0xa8] sm:$0xff]  ;;  %v41_v7 = vld [vmem:[%s645_s1 + $0x58] sm:$0xff]  ;;  %v50_v8 = vld [vmem:[%s645_s1 + $0xa0] sm:$0xff] }
   0x4   :  { %75 = vmatpush.msra.mxu0 %v44_v1  ;;  %v40_v9 = vld [vmem:[%s645_s1 + $0x50] sm:$0xff]  ;;  %v49_v10 = vld [vmem:[%s645_s1 + $0x98] sm:$0xff]  ;;  %v39_v11 = vld [vmem:[%s645_s1 + $0x48] sm:$0xff] }
   0x5   :  { %115 = vmatpush.msra.mxu1 %v52_v5  ;;  %329 = vmatpush.msra.mxu2 %v52_v5  ;;  %v48_v12 = vld [vmem:[%s645_s1 + $0x90] sm:$0xff]  ;;  %v38_v13 = vld [vmem:[%s645_s1 + $0x40] sm:$0xff]  ;;  %v47_v14 = vld [vmem:[%s645_s1 + $0x88] sm:$0xff] }
   0x6   :  { %76 = vmatpush.msra.mxu0 %v43_v2  ;;  %v37_v15 = vld [vmem:[%s645_s1 + $0x38] sm:$0xff]  ;;  %v46_v16 = vld [vmem:[%s645_s1 + $0x80] sm:$0xff]  ;;  %v36_v17 = vld [vmem:[%s645_s1 + $0x30] sm:$0xff] }
   0x7   :  { %116 = vmatpush.msra.mxu1 %v51_v6  ;;  %330 = vmatpush.msra.mxu2 %v51_v6  ;;  %v21_v18 = vld [vmem:[%s647_s0 + $0x8] sm:$0xff]  ;;  %v34_v20 = vld [vmem:[%s645_s1 + $0x20] sm:$0xff]  ;;  %v33_v21 = vld [vmem:[%s645_s1 + $0x18] sm:$0xff] }
   0x8   :  { %77 = vmatpush.msra.mxu0 %v42_v4  ;;  %v35_v19 = vld [vmem:[%s645_s1 + $0x28] sm:$0xff]  ;;  %v32_v22 = vld [vmem:[%s645_s1 + $0x10] sm:$0xff]  ;;  %v23_v23 = vld [vmem:[%s647_s0 + $0x18] sm:$0xff] }
   0x9   :  { %117 = vmatpush.msra.mxu1 %v50_v8  ;;  %331 = vmatpush.msra.mxu2 %v50_v8  ;;  %v29_v24 = vld [vmem:[%s647_s0 + $0x48] sm:$0xff]  ;;  %v30_v26 = vld [vmem:[%s645_s1] sm:$0xff]  ;;  %v191_v29 = vld [vmem:[%s648_s3 + $0x78] sm:$0xff] }
   0xa   :  { %78 = vmatpush.msra.mxu0 %v41_v7  ;;  %v31_v25 = vld [vmem:[%s645_s1 + $0x8] sm:$0xff]  ;;  %v20_v27 = vld [vmem:[%s647_s0] sm:$0xff]  ;;  %v190_v30 = vld [vmem:[%s648_s3 + $0x70] sm:$0xff] }
   0xb   :  { %118 = vmatpush.msra.mxu1 %v49_v10  ;;  %332 = vmatpush.msra.mxu2 %v49_v10  ;;  %v25_v28 = vld [vmem:[%s647_s0 + $0x28] sm:$0xff]  ;;  %v207_v32 = vld [vmem:[%s648_s3 + $0xf8] sm:$0xff]  ;;  %v206_v34 = vld [vmem:[%s648_s3 + $0xf0] sm:$0xff] }
   0xc   :  { %79 = vmatpush.msra.mxu0 %v40_v9  ;;  %v189_v31 = vld [vmem:[%s648_s3 + $0x68] sm:$0xff]  ;;  %v223_v33 = vld [vmem:[%s648_s3 + $0x178] sm:$0xff]  ;;  %v222_v35 = vld [vmem:[%s648_s3 + $0x170] sm:$0xff]  ;;  %257 = vmatpush.msra.mxu3 %v207_v32 }
   0xd   :  { %119 = vmatpush.msra.mxu1 %v48_v12  ;;  %333 = vmatpush.msra.mxu2 %v48_v12  ;;  %v188_v36 = vld [vmem:[%s648_s3 + $0x60] sm:$0xff]  ;;  %v22_v37 = vld [vmem:[%s647_s0 + $0x10] sm:$0xff]  ;;  %v205_v38 = vld [vmem:[%s648_s3 + $0xe8] sm:$0xff] }
   0xe   :  { %80 = vmatpush.msra.mxu0 %v39_v11  ;;  %v187_v39 = vld [vmem:[%s648_s3 + $0x58] sm:$0xff]  ;;  %258 = vmatpush.msra.mxu3 %v206_v34  ;;  %v221_v40 = vld [vmem:[%s648_s3 + $0x168] sm:$0xff]  ;;  %v204_v41 = vld [vmem:[%s648_s3 + $0xe0] sm:$0xff] }
   0xf   :  { %120 = vmatpush.msra.mxu1 %v47_v14  ;;  %334 = vmatpush.msra.mxu2 %v47_v14  ;;  %v27_v42 = vld [vmem:[%s647_s0 + $0x38] sm:$0xff]  ;;  %v186_v43 = vld [vmem:[%s648_s3 + $0x50] sm:$0xff]  ;;  %v220_v44 = vld [vmem:[%s648_s3 + $0x160] sm:$0xff] }
  0x10   :  { %81 = vmatpush.msra.mxu0 %v38_v13  ;;  %259 = vmatpush.msra.mxu3 %v205_v38  ;;  %v203_v45 = vld [vmem:[%s648_s3 + $0xd8] sm:$0xff]  ;;  %v185_v46 = vld [vmem:[%s648_s3 + $0x48] sm:$0xff]  ;;  %v202_v48 = vld [vmem:[%s648_s3 + $0xd0] sm:$0xff] }
  0x11   :  { %121 = vmatpush.msra.mxu1 %v46_v16  ;;  %335 = vmatpush.msra.mxu2 %v46_v16  ;;  %v219_v47 = vld [vmem:[%s648_s3 + $0x158] sm:$0xff]  ;;  %v184_v49 = vld [vmem:[%s648_s3 + $0x40] sm:$0xff]  ;;  %v218_v51 = vld [vmem:[%s648_s3 + $0x150] sm:$0xff] }
  0x12   :  { %82 = vmatpush.msra.mxu0 %v37_v15  ;;  %323 = vmatmul.msk.f32.vlgmr.msra.gmra.mxu1 %vm58_vm0, %v21_v18  ;;  %v24_v50 = vld [vmem:[%s647_s0 + $0x20] sm:$0xff]  ;;  %v183_v52 = vld [vmem:[%s648_s3 + $0x38] sm:$0xff]  ;;  %v201_v53 = vld [vmem:[%s648_s3 + $0xc8] sm:$0xff] }
  0x13   :  { %327 = vmatmul.msk.f32.vlgmr.msra.gmra.mxu2 %vm58_vm0, %v29_v24  ;;  %286 = vmatpush.msrb.mxu1 %v223_v33  ;;  %v217_v54 = vld [vmem:[%s648_s3 + $0x148] sm:$0xff]  ;;  %v182_v55 = vld [vmem:[%s648_s3 + $0x30] sm:$0xff]  ;;  %v180_v57 = vld [vmem:[%s648_s3 + $0x20] sm:$0xff] }
  0x14   :  { %83 = vmatpush.msra.mxu0 %v36_v17  ;;  %228 = vmatpush.msrb.mxu2 %v191_v29  ;;  %v181_v56 = vld [vmem:[%s648_s3 + $0x28] sm:$0xff]  ;;  %v26_v58 = vld [vmem:[%s647_s0 + $0x30] sm:$0xff]  ;;  %v28_v59 = vld [vmem:[%s647_s0 + $0x40] sm:$0xff] }
  0x15   :  { %287 = vmatpush.msrb.mxu1 %v222_v35  ;;  %260 = vmatpush.msra.mxu3 %v204_v41  ;;  %v179_v60 = vld [vmem:[%s648_s3 + $0x18] sm:$0xff]  ;;  %v200_v61 = vld [vmem:[%s648_s3 + $0xc0] sm:$0xff]  ;;  %v178_v63 = vld [vmem:[%s648_s3 + $0x10] sm:$0xff] }
  0x16   :  { %84 = vmatpush.msra.mxu0 %v35_v19  ;;  %229 = vmatpush.msrb.mxu2 %v190_v30  ;;  %v216_v62 = vld [vmem:[%s648_s3 + $0x140] sm:$0xff]  ;;  %v199_v0 = vld [vmem:[%s648_s3 + $0xb8] sm:$0xff]  ;;  %v177_v2 = vld [vmem:[%s648_s3 + $0x8] sm:$0xff] }
  0x17   :  { %288 = vmatpush.msrb.mxu1 %v221_v40  ;;  %261 = vmatpush.msra.mxu3 %v203_v45  ;;  %v215_v1 = vld [vmem:[%s648_s3 + $0x138] sm:$0xff]  ;;  %v198_v3 = vld [vmem:[%s648_s3 + $0xb0] sm:$0xff]  ;;  %v176_v5 = vld [vmem:[%s648_s3] sm:$0xff] }
  0x18   :  { %85 = vmatpush.msra.mxu0 %v34_v20  ;;  %230 = vmatpush.msrb.mxu2 %v189_v31  ;;  %v214_v4 = vld [vmem:[%s648_s3 + $0x130] sm:$0xff]  ;;  %v197_v6 = vld [vmem:[%s648_s3 + $0xa8] sm:$0xff]  ;;  %v196_v8 = vld [vmem:[%s648_s3 + $0xa0] sm:$0xff] }
  0x19   :  { %289 = vmatpush.msrb.mxu1 %v220_v44  ;;  %262 = vmatpush.msra.mxu3 %v202_v48  ;;  %v213_v7 = vld [vmem:[%s648_s3 + $0x128] sm:$0xff]  ;;  %v212_v9 = vld [vmem:[%s648_s3 + $0x120] sm:$0xff]  ;;  %v195_v10 = vld [vmem:[%s648_s3 + $0x98] sm:$0xff] }
  0x1a   :  { %86 = vmatpush.msra.mxu0 %v33_v21  ;;  %324 = vmatmul.msk.f32.gmra.mxu1 %vm58_vm0, %v23_v23  ;;  %v211_v11 = vld [vmem:[%s648_s3 + $0x118] sm:$0xff]  ;;  %v194_v12 = vld [vmem:[%s648_s3 + $0x90] sm:$0xff]  ;;  %v193_v14 = vld [vmem:[%s648_s3 + $0x88] sm:$0xff] }
  0x1b   :  { %231 = vmatpush.msrb.mxu2 %v188_v36  ;;  %290 = vmatpush.msrb.mxu1 %v219_v47  ;;  %v210_v13 = vld [vmem:[%s648_s3 + $0x110] sm:$0xff]  ;;  %v209_v15 = vld [vmem:[%s648_s3 + $0x108] sm:$0xff]  ;;  %v192_v16 = vld [vmem:[%s648_s3 + $0x80] sm:$0xff] }
  0x1c   :  { %87 = vmatpush.msra.mxu0 %v32_v22  ;;  %263 = vmatpush.msra.mxu3 %v201_v53  ;;  %v208_v17 = vld [vmem:[%s648_s3 + $0x100] sm:$0xff] }
  0x1d   :  { %232 = vmatpush.msrb.mxu2 %v187_v39  ;;  %291 = vmatpush.msrb.mxu1 %v218_v51  ;;  %v336_v19 = vld [vmem:[%s646_s2] ss:$0 sm:$0xff] }
  0x1e   :  { %88 = vmatpush.msra.mxu0 %v31_v25  ;;  %264 = vmatpush.msra.mxu3 %v200_v61 }
  0x1f   :  { %233 = vmatpush.msrb.mxu2 %v186_v43  ;;  %292 = vmatpush.msrb.mxu1 %v217_v54 }
  0x20   :  { %89 = vmatpush.msra.mxu0 %v30_v26  ;;  %265 = vmatpush.msra.mxu3 %v199_v0 }
  0x21   :  { %90 = vmatmul.f32.vlgmr.msra.gmra.mxu0 %v20_v27  ;;  %234 = vmatpush.msrb.mxu2 %v185_v46 }
  0x22   :  { %325 = vmatmul.msk.f32.gmra.mxu1 %vm58_vm0, %v25_v28  ;;  %266 = vmatpush.msra.mxu3 %v198_v3 }
  0x23   :  { %235 = vmatpush.msrb.mxu2 %v184_v49  ;;  %293 = vmatpush.msrb.mxu1 %v216_v62 }
  0x24   :  { %267 = vmatpush.msra.mxu3 %v197_v6 }
  0x25   :  { %236 = vmatpush.msrb.mxu2 %v183_v52  ;;  %294 = vmatpush.msrb.mxu1 %v215_v1 }
  0x26   :  { %268 = vmatpush.msra.mxu3 %v196_v8 }
  0x27   :  { %237 = vmatpush.msrb.mxu2 %v182_v55  ;;  %295 = vmatpush.msrb.mxu1 %v214_v4 }
  0x28   :  { %269 = vmatpush.msra.mxu3 %v195_v10 }
  0x29   :  { %93 = vmatmul.f32.gmra.mxu0 %v22_v37  ;;  %238 = vmatpush.msrb.mxu2 %v181_v56 }
  0x2a   :  { %326 = vmatmul.msk.f32.gmra.mxu1 %vm58_vm0, %v27_v42  ;;  %270 = vmatpush.msra.mxu3 %v194_v12 }
  0x2b   :  { %239 = vmatpush.msrb.mxu2 %v180_v57  ;;  %296 = vmatpush.msrb.mxu1 %v213_v7 }
  0x2c   :  { %271 = vmatpush.msra.mxu3 %v193_v14 }
  0x2d   :  { %240 = vmatpush.msrb.mxu2 %v179_v60  ;;  %297 = vmatpush.msrb.mxu1 %v212_v9 }
  0x2e   :  { %272 = vmatpush.msra.mxu3 %v192_v16 }
  0x2f   :  { %241 = vmatpush.msrb.mxu2 %v178_v63  ;;  %298 = vmatpush.msrb.mxu1 %v211_v11  ;;  %v337_v63 = vld [vmem:[%s649_s4] ss:$0 sm:$0xff] }
  0x31   :  { %96 = vmatmul.f32.gmra.mxu0 %v24_v50  ;;  %242 = vmatpush.msrb.mxu2 %v177_v2 }
  0x32   :  { %299 = vmatpush.msrb.mxu1 %v210_v13 }
  0x33   :  { %243 = vmatpush.msrb.mxu2 %v176_v5 }
  0x34   :  { %300 = vmatpush.msrb.mxu1 %v209_v15 }
  0x36   :  { %301 = vmatpush.msrb.mxu1 %v208_v17 }
  0x39   :  { %99 = vmatmul.f32.gmra.mxu0 %v26_v58 }
  0x41   :  { %102 = vmatmul.f32.gmra.mxu0 %v28_v59 }
  0x8f   :  { %v123_v18 = vpop.f32.mrf.mxu1 }
  0x96   :  { %v135_v52 = vpop.f32.mrf.mxu2 }
  0x97   :  { %v126_v23 = vpop.f32.mrf.mxu1 }
  0x9e   :  { %v91_v20 = vpop.f32.mrf.mxu0 }
  0x9f   :  { %v92_v21 = vadd.f32 %v336_v19, %v91_v20  ;;  %v129_v29 = vpop.f32.mrf.mxu1 }
  0xa1   :  { %v124_v22 = vadd.f32 %v123_v18, %v92_v21 }
  0xa3   :  { %v138_v24 = vmax.f32 %v124_v22, 0.0 }
  0xa5   :  { %244 = vmatmul.f32.vlgmr.msrb.gmra.mxu2 %v138_v24  ;;  %v163_v30 = vrot.slane %v138_v24, 2  ;;  %v149_v32 = vrot.slane %v138_v24, 1 }
  0xa6   :  { %v94_v25 = vpop.f32.mrf.mxu0 }
  0xa7   :  { %v95_v26 = vadd.f32 %v336_v19, %v94_v25  ;;  %v132_v43 = vpop.f32.mrf.mxu1 }
  0xa9   :  { %v127_v27 = vadd.f32 %v126_v23, %v95_v26 }
  0xab   :  { %v139_v28 = vmax.f32 %v127_v27, 0.0 }
  0xad   :  { %v164_v31 = vrot.slane %v139_v28, 2  ;;  %247 = vmatmul.f32.gmra.mxu2 %v139_v28  ;;  %v150_v33 = vrot.slane %v139_v28, 1 }
  0xae   :  { %v97_v34 = vpop.f32.mrf.mxu0 }
  0xaf   :  { %v98_v35 = vadd.f32 %v336_v19, %v97_v34  ;;  %v151_v36 = vsel %vm148_vm1, %v149_v32, %v150_v33  ;;  %v165_v37 = vsel %vm162_vm2, %v163_v30, %v164_v31 }
  0xb0   :  { %273 = vmatmul.f32.vlgmr.msra.gmra.mxu3 %v151_v36  ;;  %302 = vmatmul.f32.vlgmr.msrb.gmra.mxu1 %v165_v37 }
  0xb1   :  { %v130_v38 = vadd.f32 %v129_v29, %v98_v35 }
  0xb3   :  { %v140_v39 = vmax.f32 %v130_v38, 0.0 }
  0xb5   :  { %250 = vmatmul.f32.gmra.mxu2 %v140_v39  ;;  %v152_v40 = vrot.slane %v140_v39, 1  ;;  %v166_v41 = vrot.slane %v140_v39, 2 }
  0xb6   :  { %v100_v42 = vpop.f32.mrf.mxu0 }
  0xb7   :  { %v101_v44 = vadd.f32 %v336_v19, %v100_v42  ;;  %v153_v45 = vsel %vm148_vm1, %v150_v33, %v152_v40  ;;  %v167_v46 = vsel %vm162_vm2, %v164_v31, %v166_v41 }
  0xb8   :  { %276 = vmatmul.f32.gmra.mxu3 %v153_v45  ;;  %305 = vmatmul.f32.gmra.mxu1 %v167_v46 }
  0xb9   :  { %v133_v47 = vadd.f32 %v132_v43, %v101_v44 }
  0xbb   :  { %v141_v48 = vmax.f32 %v133_v47, 0.0 }
  0xbd   :  { %253 = vmatmul.f32.gmra.mxu2 %v141_v48  ;;  %v154_v49 = vrot.slane %v141_v48, 1  ;;  %v168_v50 = vrot.slane %v141_v48, 2 }
  0xbe   :  { %v103_v51 = vpop.f32.mrf.mxu0 }
  0xbf   :  { %v104_v53 = vadd.f32 %v336_v19, %v103_v51  ;;  %v155_v54 = vsel %vm148_vm1, %v152_v40, %v154_v49  ;;  %v169_v55 = vsel %vm162_vm2, %v166_v41, %v168_v50 }
  0xc0   :  { %279 = vmatmul.f32.gmra.mxu3 %v155_v54  ;;  %308 = vmatmul.f32.gmra.mxu1 %v169_v55 }
  0xc1   :  { %v136_v56 = vadd.f32 %v135_v52, %v104_v53 }
  0xc3   :  { %v142_v57 = vmax.f32 %v136_v56, 0.0 }
  0xc5   :  { %v156_v58 = vrot.slane %v142_v57, 1  ;;  %v170_v59 = vrot.slane %v142_v57, 2 }
  0xc7   :  { %v157_v60 = vsel %vm148_vm1, %v154_v49, %v156_v58  ;;  %v171_v61 = vsel %vm162_vm2, %v168_v50, %v170_v59 }
  0xc8   :  { %282 = vmatmul.f32.gmra.mxu3 %v157_v60  ;;  %311 = vmatmul.f32.gmra.mxu1 %v171_v61 }
 0x128   :  { %v245_v62 = vpop.f32.mrf.mxu2 }
 0x129   :  { %v246_v1 = vadd.f32 %v337_v63, %v245_v62 }
 0x12d   :  { %v303_v0 = vpop.f32.mrf.mxu1 }
 0x130   :  { %v248_v2 = vpop.f32.mrf.mxu2 }
 0x131   :  { %v249_v7 = vadd.f32 %v337_v63, %v248_v2 }
 0x133   :  { %v274_v3 = vpop.f32.mrf.mxu3 }
 0x134   :  { %v275_v4 = vadd.f32 %v274_v3, %v246_v1 }
 0x135   :  { %v306_v6 = vpop.f32.mrf.mxu1 }
 0x136   :  { %v304_v5 = vadd.f32 %v303_v0, %v275_v4 }
 0x138   :  { %315 = vst [vmem:[%s650_s5] sm:$0xff] %v304_v5  ;;  %v251_v10 = vpop.f32.mrf.mxu2 }
 0x139   :  { %v252_v12 = vadd.f32 %v337_v63, %v251_v10 }
 0x13b   :  { %v277_v8 = vpop.f32.mrf.mxu3 }
 0x13c   :  { %v278_v9 = vadd.f32 %v277_v8, %v249_v7 }
 0x13d   :  { %v309_v13 = vpop.f32.mrf.mxu1 }
 0x13e   :  { %v307_v11 = vadd.f32 %v306_v6, %v278_v9 }
 0x140   :  { %316 = vst [vmem:[%s650_s5 + $0x8] sm:$0xff] %v307_v11  ;;  %v254_v17 = vpop.f32.mrf.mxu2 }
 0x141   :  { %v255_v18 = vadd.f32 %v337_v63, %v254_v17 }
 0x143   :  { %v280_v14 = vpop.f32.mrf.mxu3 }
 0x144   :  { %v281_v15 = vadd.f32 %v280_v14, %v252_v12 }
 0x145   :  { %v312_v21 = vpop.f32.mrf.mxu1 }
 0x146   :  { %v310_v16 = vadd.f32 %v309_v13, %v281_v15 }
 0x148   :  { %317 = vst [vmem:[%s650_s5 + $0x10] sm:$0xff] %v310_v16 }
 0x14b   :  { %v283_v19 = vpop.f32.mrf.mxu3 }
 0x14c   :  { %v284_v20 = vadd.f32 %v283_v19, %v255_v18 }
 0x14e   :  { %v313_v22 = vadd.f32 %v312_v21, %v284_v20 }
 0x150   :  { %318 = vst [vmem:[%s650_s5 + $0x18] sm:$0xff] %v313_v22 }

</bundles_post_ra>
